<compile_context>
chip_gen: v6e
topology: v6e:2x2x1
jax: 0.10.0
libtpu: 0.0.40
codegen_flags: <defaults>
</compile_context>

<pallas_src>
import functools

import jax
import jax.numpy as jnp
from jax.experimental import pallas as pl
from jax.experimental.pallas import tpu as pltpu

LANES = 128        # TPU lane width — batch tiles aligned to this (lane-dense output)
OUT_SUBLANES = 8   # f32 sublane granularity — Q rows padded to this


def _round_up(n, m):
    return ((n + m - 1) // m) * m


def _target_grid_steps():
    """1 grid step on single-TC chips (v5e/v6e); 2 on v7x (one per TensorCore)."""
    try:
        kind = jax.devices()[0].device_kind.lower()
    except Exception:
        return 1
    return 2 if any(t in kind for t in ("v7", "tpu7", "tpu 7")) else 1


def qnetwork_kernel(x_ref, w1_ref, b1_ref, w2_ref, b2_ref, w3t_ref, b3t_ref, o_ref):
    """One batch tile: (Linear+ReLU) x2 + transposed Linear. bf16 MXU, f32 accum."""
    # Layer 1: Linear + ReLU (x cast to bf16 in-kernel — near-free VPU repack).
    x = x_ref[...].astype(jnp.bfloat16)
    h1 = jnp.dot(x, w1_ref[...], preferred_element_type=jnp.float32)
    h1 = jnp.maximum(h1 + b1_ref[...], 0.0)
    # Layer 2: Linear + ReLU.
    h2 = jnp.dot(h1.astype(jnp.bfloat16), w2_ref[...], preferred_element_type=jnp.float32)
    h2 = jnp.maximum(h2 + b2_ref[...], 0.0)
    # Layer 3 (transposed): out_T = W3^T @ h2^T -> (8, tile_b), batch on lanes.
    # The f32 transpose runs on the XLU (separate bundle slot); store is lane-dense.
    h2_t = h2.T.astype(jnp.bfloat16)
    out_t = jnp.dot(w3t_ref[...], h2_t, preferred_element_type=jnp.float32)
    o_ref[...] = (out_t + b3t_ref[...]).astype(o_ref.dtype)


def prepare_params(params):
    """One-time weight prep: bf16 casts, transposed/padded final layer.

    Returns (prepared_arrays_dict, action_dim). Call once; reuse across forwards.
    """
    w1, b1 = params["w1"], params["b1"]
    w2, b2 = params["w2"], params["b2"]
    w3, b3 = params["w3"], params["b3"]
    hidden_dim = w1.shape[1]
    action_dim = w3.shape[1]
    n_pad = _round_up(action_dim, OUT_SUBLANES)

    # Final layer stored transposed + zero-padded to 8 sublane rows.
    w3t = jnp.zeros((n_pad, hidden_dim), jnp.bfloat16)
    w3t = w3t.at[:action_dim, :].set(w3.T.astype(jnp.bfloat16))
    b3t = jnp.zeros((n_pad, 1), jnp.float32)
    b3t = b3t.at[:action_dim, :].set(b3.reshape(-1, 1).astype(jnp.float32))

    prepared = {
        "w1": w1.astype(jnp.bfloat16),
        "b1": b1.reshape(1, -1).astype(jnp.float32),
        "w2": w2.astype(jnp.bfloat16),
        "b2": b2.reshape(1, -1).astype(jnp.float32),
        "w3t": w3t,
        "b3t": b3t,
    }
    return prepared, action_dim


def qnetwork_forward(x, prepared, action_dim, *, num_steps=None, max_tile_b=4096):
    """x: (B, state_dim) f32. prepared: output of prepare_params. Returns (B, action_dim)."""
    B, state_dim = x.shape
    n_pad, hidden_dim = prepared["w3t"].shape

    if num_steps is None:
        num_steps = _target_grid_steps()

    # Minimal number of grid steps; tile_b lane-aligned (lane-dense transposed output),
    # capped so f32 intermediates stay small in VMEM even for huge batches.
    tile_b = min(_round_up(pl.cdiv(B, num_steps), LANES), max_tile_b)
    B_pad = _round_up(B, tile_b)

    xf = x.astype(jnp.float32)
    if B_pad != B:
        xf = jnp.pad(xf, ((0, B_pad - B), (0, 0)))
    grid = (B_pad // tile_b,)

    # Weights / biases: full-array blocks, constant index_map -> DMA'd once, VMEM-resident.
    const = lambda a: pl.BlockSpec(a.shape, lambda i: (0,) * a.ndim)

    out_t = pl.pallas_call(
        qnetwork_kernel,
        out_shape=jax.ShapeDtypeStruct((n_pad, B_pad), jnp.float32),
        grid=grid,
        in_specs=[
            pl.BlockSpec((tile_b, state_dim), lambda i: (i, 0)),   # x streams by batch tile (f32)
            const(prepared["w1"]), const(prepared["b1"]),
            const(prepared["w2"]), const(prepared["b2"]),
            const(prepared["w3t"]), const(prepared["b3t"]),
        ],
        out_specs=pl.BlockSpec((n_pad, tile_b), lambda i: (0, i)),  # batch on lanes
        compiler_params=pltpu.CompilerParams(
            dimension_semantics=("parallel",),   # shard batch grid across v7x TCs
            vmem_limit_bytes=16 * 1024 * 1024,   # actual usage << 4 MiB; headroom on all gens
        ),
    )(xf, prepared["w1"], prepared["b1"], prepared["w2"], prepared["b2"],
      prepared["w3t"], prepared["b3t"])

    # Slice off padded Q rows / padded batch columns, return (B, action_dim).
    return out_t[:action_dim, :B].T


def init_params(key, state_dim, action_dim, hidden_dim):
    """Deterministic init mimicking PyTorch Linear default (uniform ±1/sqrt(fan_in))."""
    ks = jax.random.split(key, 6)

    def uinit(k, shape, fan_in):
        bound = 1.0 / jnp.sqrt(fan_in)
        return jax.random.uniform(k, shape, jnp.float32, -bound, bound)

    return {
        "w1": uinit(ks[0], (state_dim, hidden_dim), state_dim),
        "b1": uinit(ks[1], (1, hidden_dim), state_dim),
        "w2": uinit(ks[2], (hidden_dim, hidden_dim), hidden_dim),
        "b2": uinit(ks[3], (1, hidden_dim), hidden_dim),
        "w3": uinit(ks[4], (hidden_dim, action_dim), hidden_dim),
        "b3": uinit(ks[5], (1, action_dim), hidden_dim),
    }


def reference_forward_f32(x, p):
    h1 = jnp.maximum(x @ p["w1"] + p["b1"], 0.0)
    h2 = jnp.maximum(h1 @ p["w2"] + p["b2"], 0.0)
    return h2 @ p["w3"] + p["b3"]


def reference_forward_bf16(x, p):
    """Same numerics as the kernel (bf16 operands, f32 accumulation)."""
    xb = x.astype(jnp.bfloat16)
    h1 = jnp.dot(xb, p["w1"].astype(jnp.bfloat16), preferred_element_type=jnp.float32)
    h1 = jnp.maximum(h1 + p["b1"], 0.0)
    h2 = jnp.dot(h1.astype(jnp.bfloat16), p["w2"].astype(jnp.bfloat16),
                 preferred_element_type=jnp.float32)
    h2 = jnp.maximum(h2 + p["b2"], 0.0)
    return jnp.dot(h2.astype(jnp.bfloat16), p["w3"].astype(jnp.bfloat16),
                   preferred_element_type=jnp.float32) + p["b3"]


if __name__ == "__main__":
    key = jax.random.PRNGKey(0)
    k_params, k_x = jax.random.split(key)

    # hidden_dim matches the PyTorch module default (128); batch=256 gives
    # grid=(1,) on v5e/v6e and grid=(2,) (one tile per TensorCore) on v7x.
    batch, state_dim, action_dim, hidden_dim = 256, 16, 4, 128
    params = init_params(k_params, state_dim, action_dim, hidden_dim)
    prepared, adim = prepare_params(params)           # one-time weight prep
    x = jax.random.normal(k_x, (batch, state_dim), jnp.float32)

    fwd = jax.jit(lambda xx: qnetwork_forward(xx, prepared, adim))
    out = jax.block_until_ready(fwd(x))
    assert out.shape == (batch, action_dim)

    # Tight check against a precision-matched (bf16 matmul / f32 accum) reference.
    ref_bf16 = reference_forward_bf16(x, params)
    assert jnp.allclose(out, ref_bf16, atol=1e-2, rtol=1e-2), "mismatch vs bf16-matched reference"

    # Sanity check against the full-f32 reference (bf16 quantization error only).
    ref_f32 = reference_forward_f32(x, params)
    max_diff = float(jnp.max(jnp.abs(out - ref_f32)))
    assert max_diff < 0.1, f"unexpectedly large bf16 deviation vs f32 reference: {max_diff}"

    print("KERNEL_OK")
</pallas_src>

<mosaic_0001>
module attributes {stable_mosaic.version = 11 : i64} {
  func.func @qnetwork_kernel(%arg0: i32, %arg1: memref<256x16xf32, #tpu.memory_space<vmem>>, %arg2: memref<16x128xbf16, #tpu.memory_space<vmem>>, %arg3: memref<1x128xf32, #tpu.memory_space<vmem>>, %arg4: memref<128x128xbf16, #tpu.memory_space<vmem>>, %arg5: memref<1x128xf32, #tpu.memory_space<vmem>>, %arg6: memref<8x128xbf16, #tpu.memory_space<vmem>>, %arg7: memref<8x1xf32, #tpu.memory_space<vmem>>, %arg8: memref<8x256xf32, #tpu.memory_space<vmem>>) attributes {dimension_semantics = [#tpu.dimension_semantics<parallel>], iteration_bounds = array<i64: 1>, scalar_prefetch = 0 : i64, scratch_operands = 0 : i64, tpu.core_type = #tpu.core_type<tc>, window_params = [{transform_indices = @transform_0, window_bounds = array<i64: 256, 16>}, {pipeline_mode = #tpu.pipeline_mode<synchronous>, transform_indices = @transform_1, window_bounds = array<i64: 16, 128>}, {pipeline_mode = #tpu.pipeline_mode<synchronous>, transform_indices = @transform_2, window_bounds = array<i64: 1, 128>}, {pipeline_mode = #tpu.pipeline_mode<synchronous>, transform_indices = @transform_3, window_bounds = array<i64: 128, 128>}, {pipeline_mode = #tpu.pipeline_mode<synchronous>, transform_indices = @transform_4, window_bounds = array<i64: 1, 128>}, {pipeline_mode = #tpu.pipeline_mode<synchronous>, transform_indices = @transform_5, window_bounds = array<i64: 8, 128>}, {pipeline_mode = #tpu.pipeline_mode<synchronous>, transform_indices = @transform_6, window_bounds = array<i64: 8, 1>}, {transform_indices = @transform_7, window_bounds = array<i64: 8, 256>}]} {
    %c0 = arith.constant 0 : index
    %c0_0 = arith.constant 0 : index
    %0 = vector.load %arg1[%c0, %c0_0] : memref<256x16xf32, #tpu.memory_space<vmem>>, vector<256x16xf32>
    %1 = arith.truncf %0 : vector<256x16xf32> to vector<256x16xbf16>
    %c0_1 = arith.constant 0 : index
    %c0_2 = arith.constant 0 : index
    %2 = vector.load %arg2[%c0_1, %c0_2] : memref<16x128xbf16, #tpu.memory_space<vmem>>, vector<16x128xbf16>
    %cst = arith.constant dense<0.000000e+00> : vector<256x128xf32>
    %3 = tpu.matmul %1, %2, %cst {dimension_numbers = #tpu.dot_dimension_numbers<[1], [0], [0], [1], [0, 0, 1, 1], [], []>} : vector<256x16xbf16>, vector<16x128xbf16>, vector<256x128xf32> -> vector<256x128xf32>
    %c0_3 = arith.constant 0 : index
    %c0_4 = arith.constant 0 : index
    %4 = vector.load %arg3[%c0_3, %c0_4] : memref<1x128xf32, #tpu.memory_space<vmem>>, vector<1x128xf32>
    %5 = vector.broadcast %4 : vector<1x128xf32> to vector<256x128xf32>
    %6 = arith.addf %3, %5 : vector<256x128xf32>
    %cst_5 = arith.constant 0.000000e+00 : f32
    %7 = vector.broadcast %cst_5 : f32 to vector<256x128xf32>
    %8 = arith.maximumf %6, %7 : vector<256x128xf32>
    %9 = arith.truncf %8 : vector<256x128xf32> to vector<256x128xbf16>
    %c0_6 = arith.constant 0 : index
    %c0_7 = arith.constant 0 : index
    %10 = vector.load %arg4[%c0_6, %c0_7] : memref<128x128xbf16, #tpu.memory_space<vmem>>, vector<128x128xbf16>
    %cst_8 = arith.constant dense<0.000000e+00> : vector<256x128xf32>
    %11 = tpu.matmul %9, %10, %cst_8 {dimension_numbers = #tpu.dot_dimension_numbers<[1], [0], [0], [1], [0, 0, 1, 1], [], []>} : vector<256x128xbf16>, vector<128x128xbf16>, vector<256x128xf32> -> vector<256x128xf32>
    %c0_9 = arith.constant 0 : index
    %c0_10 = arith.constant 0 : index
    %12 = vector.load %arg5[%c0_9, %c0_10] : memref<1x128xf32, #tpu.memory_space<vmem>>, vector<1x128xf32>
    %13 = vector.broadcast %12 : vector<1x128xf32> to vector<256x128xf32>
    %14 = arith.addf %11, %13 : vector<256x128xf32>
    %cst_11 = arith.constant 0.000000e+00 : f32
    %15 = vector.broadcast %cst_11 : f32 to vector<256x128xf32>
    %16 = arith.maximumf %14, %15 : vector<256x128xf32>
    %17 = tpu.transpose %16, [1, 0] : vector<256x128xf32> -> vector<128x256xf32>
    %18 = arith.truncf %17 : vector<128x256xf32> to vector<128x256xbf16>
    %c0_12 = arith.constant 0 : index
    %c0_13 = arith.constant 0 : index
    %19 = vector.load %arg6[%c0_12, %c0_13] : memref<8x128xbf16, #tpu.memory_space<vmem>>, vector<8x128xbf16>
    %cst_14 = arith.constant dense<0.000000e+00> : vector<8x256xf32>
    %20 = tpu.matmul %19, %18, %cst_14 {dimension_numbers = #tpu.dot_dimension_numbers<[1], [0], [0], [1], [0, 0, 1, 1], [], []>} : vector<8x128xbf16>, vector<128x256xbf16>, vector<8x256xf32> -> vector<8x256xf32>
    %c0_15 = arith.constant 0 : index
    %c0_16 = arith.constant 0 : index
    %21 = vector.load %arg7[%c0_15, %c0_16] : memref<8x1xf32, #tpu.memory_space<vmem>>, vector<8x1xf32>
    %22 = vector.broadcast %21 : vector<8x1xf32> to vector<8x256xf32>
    %23 = arith.addf %20, %22 : vector<8x256xf32>
    %c0_17 = arith.constant 0 : index
    %c0_18 = arith.constant 0 : index
    %24 = vector.load %arg8[%c0_17, %c0_18] : memref<8x256xf32, #tpu.memory_space<vmem>>, vector<8x256xf32>
    tpu.vector_store %arg8[%c0_17, %c0_18], %23 {strides = array<i32>} : memref<8x256xf32, #tpu.memory_space<vmem>>, vector<8x256xf32>,
    return
  }
  func.func @transform_0(%arg0: i32) -> (i32, i32) {
    %c0_i32 = arith.constant 0 : i32
    %c0_i32_0 = arith.constant 0 : i32
    return %arg0, %c0_i32 : i32, i32
  }
  func.func @transform_1(%arg0: i32) -> (i32, i32) {
    %c0_i32 = arith.constant 0 : i32
    %c0_i32_0 = arith.constant 0 : i32
    %c0_i32_1 = arith.constant 0 : i32
    return %c0_i32, %c0_i32_0 : i32, i32
  }
  func.func @transform_2(%arg0: i32) -> (i32, i32) {
    %c0_i32 = arith.constant 0 : i32
    %c0_i32_0 = arith.constant 0 : i32
    %c0_i32_1 = arith.constant 0 : i32
    return %c0_i32, %c0_i32_0 : i32, i32
  }
  func.func @transform_3(%arg0: i32) -> (i32, i32) {
    %c0_i32 = arith.constant 0 : i32
    %c0_i32_0 = arith.constant 0 : i32
    %c0_i32_1 = arith.constant 0 : i32
    return %c0_i32, %c0_i32_0 : i32, i32
  }
  func.func @transform_4(%arg0: i32) -> (i32, i32) {
    %c0_i32 = arith.constant 0 : i32
    %c0_i32_0 = arith.constant 0 : i32
    %c0_i32_1 = arith.constant 0 : i32
    return %c0_i32, %c0_i32_0 : i32, i32
  }
  func.func @transform_5(%arg0: i32) -> (i32, i32) {
    %c0_i32 = arith.constant 0 : i32
    %c0_i32_0 = arith.constant 0 : i32
    %c0_i32_1 = arith.constant 0 : i32
    return %c0_i32, %c0_i32_0 : i32, i32
  }
  func.func @transform_6(%arg0: i32) -> (i32, i32) {
    %c0_i32 = arith.constant 0 : i32
    %c0_i32_0 = arith.constant 0 : i32
    %c0_i32_1 = arith.constant 0 : i32
    return %c0_i32, %c0_i32_0 : i32, i32
  }
  func.func @transform_7(%arg0: i32) -> (i32, i32) {
    %c0_i32 = arith.constant 0 : i32
    %c0_i32_0 = arith.constant 0 : i32
    return %c0_i32, %arg0 : i32, i32
  }
}

</mosaic_0001>

<bundles_post_ra>
// kernel: _lambda_.1
= control target key start
LH: loop header
LB: loop body
LE: loop exit
PB: predicated region body
PF: predicated region fallthrough
CT: control target
= control target key end

     0   :  { %vm90_vm0 = vcmask 130048   ;;  %s1319_s1 = inlined_call_operand.vmem [shape: bf16[16,128], index: 1, kind: input, shape index: {}]   ;;  %s1320_s0 = inlined_call_operand.vmem [shape: f32[256,16], index: 0, kind: input, shape index: {}]   ;;  %s1321_s3 = inlined_call_operand.vmem [shape: bf16[128,128], index: 3, kind: input, shape index: {}]   ;;  %s1322_s2 = inlined_call_operand.vmem [shape: f32[1,128], index: 2, kind: input, shape index: {}]   ;;  %s1323_s4 = inlined_call_operand.vmem [shape: f32[1,128], index: 4, kind: input, shape index: {}]   ;;  %s1324_s6 = inlined_call_operand.vmem [shape: f32[8,1], index: 6, kind: input, shape index: {}]   ;;  %s1325_s5 = inlined_call_operand.vmem [shape: bf16[8,128], index: 5, kind: input, shape index: {}]   ;;  %s1326_s7 = inlined_call_operand.vmem [shape: f32[8,256], index: 7, kind: output, shape index: {}]  }
   0x1   :  { %v1011_v0 = vld [vmem:[%s1319_s1] sm:$0xff]   ;;  %v28_v2 = vld [vmem:[%s1320_s0 + $0x8] sm:$0xff]  ;;  %v29_v3 = vld [vmem:[%s1320_s0 + $0x10] sm:$0xff] }
   0x2   :  { %v27_v1 = vld [vmem:[%s1320_s0] sm:$0xff]  ;;  %814 = vmatprep.subr.bf16.mxu0 %v1011_v0  ;;  %v30_v5 = vld [vmem:[%s1320_s0 + $0x18] sm:$0xff]  ;;  %v32_v7 = vld [vmem:[%s1320_s0 + $0x28] sm:$0xff] }
   0x3   :  { %v59_v4 = vpack.c.bf16 %v28_v2, %v27_v1  ;;  %v31_v6 = vld [vmem:[%s1320_s0 + $0x20] sm:$0xff]  ;;  %815 = vmatpush3.bf16.msra.mxu0 %v1011_v0  ;;  %v60_v8 = vpack.c.bf16 %v30_v5, %v29_v3  ;;  %v33_v10 = vld [vmem:[%s1320_s0 + $0x30] sm:$0xff]  ;;  %v34_v11 = vld [vmem:[%s1320_s0 + $0x38] sm:$0xff] }
   0x4   :  { %v61_v9 = vpack.c.bf16 %v32_v7, %v31_v6  ;;  %v35_v12 = vld [vmem:[%s1320_s0 + $0x40] sm:$0xff]  ;;  %v36_v13 = vld [vmem:[%s1320_s0 + $0x48] sm:$0xff]  ;;  %v62_v14 = vpack.c.bf16 %v34_v11, %v33_v10  ;;  %v1012_v16 = vld [vmem:[%s1321_s3 + $0x38] sm:$0xff]  }
   0x5   :  { %816 = vmatprep.mubr.msk.bf16.mxu0 %vm90_vm0, %v59_v4  ;;  %v63_v15 = vpack.c.bf16 %v36_v13, %v35_v12  ;;  %v37_v17 = vld [vmem:[%s1320_s0 + $0x50] sm:$0xff]  ;;  %v38_v18 = vld [vmem:[%s1320_s0 + $0x58] sm:$0xff]  ;;  %v39_v20 = vld [vmem:[%s1320_s0 + $0x60] sm:$0xff]  ;;  %848 = vmatprep.subr.bf16.mxu1 %v1012_v16 }
   0x6   :  { %817 = vmatmul.mubr.msk.bf16.vlgmr.msra.gmra.mxu0 %vm90_vm0, %v60_v8  ;;  %v1013_v19 = vld [vmem:[%s1321_s3 + $0x30] sm:$0xff]   ;;  %v40_v21 = vld [vmem:[%s1320_s0 + $0x68] sm:$0xff]  ;;  %849 = vmatpush3.bf16.msra.mxu1 %v1012_v16  ;;  %v64_v23 = vpack.c.bf16 %v38_v18, %v37_v17  ;;  %v1015_v25 = vld [vmem:[%s1321_s3 + $0x20] sm:$0xff]  }
   0x7   :  { %820 = vmatprep.mubr.msk.bf16.mxu0 %vm90_vm0, %v61_v9  ;;  %850 = vmatprep.subr.bf16.mxu1 %v1013_v19  ;;  %v1014_v22 = vld [vmem:[%s1321_s3 + $0x28] sm:$0xff]   ;;  %v65_v24 = vpack.c.bf16 %v40_v21, %v39_v20  ;;  %v41_v26 = vld [vmem:[%s1320_s0 + $0x70] sm:$0xff]  ;;  %v42_v27 = vld [vmem:[%s1320_s0 + $0x78] sm:$0xff] }
   0x8   :  { %v43_v28 = vld [vmem:[%s1320_s0 + $0x80] sm:$0xff]  ;;  %v44_v29 = vld [vmem:[%s1320_s0 + $0x88] sm:$0xff]  ;;  %v1016_v30 = vld [vmem:[%s1321_s3 + $0x18] sm:$0xff]   ;;  %v66_v31 = vpack.c.bf16 %v42_v27, %v41_v26 }
   0x9   :  { %v67_v32 = vpack.c.bf16 %v44_v29, %v43_v28  ;;  %v45_v33 = vld [vmem:[%s1320_s0 + $0x90] sm:$0xff]  ;;  %v46_v34 = vld [vmem:[%s1320_s0 + $0x98] sm:$0xff]  ;;  %v47_v35 = vld [vmem:[%s1320_s0 + $0xa0] sm:$0xff] }
   0xa   :  { %851 = vmatpush3.bf16.msra.mxu1 %v1013_v19  ;;  %v48_v36 = vld [vmem:[%s1320_s0 + $0xa8] sm:$0xff]  ;;  %v68_v37 = vpack.c.bf16 %v46_v34, %v45_v33  ;;  %v49_v39 = vld [vmem:[%s1320_s0 + $0xb0] sm:$0xff]  ;;  %v50_v40 = vld [vmem:[%s1320_s0 + $0xb8] sm:$0xff] }
   0xb   :  { %852 = vmatprep.subr.bf16.mxu1 %v1014_v22  ;;  %v69_v38 = vpack.c.bf16 %v48_v36, %v47_v35  ;;  %v51_v41 = vld [vmem:[%s1320_s0 + $0xc0] sm:$0xff]  ;;  %v52_v42 = vld [vmem:[%s1320_s0 + $0xc8] sm:$0xff]  ;;  %v70_v43 = vpack.c.bf16 %v50_v40, %v49_v39  ;;  %v53_v45 = vld [vmem:[%s1320_s0 + $0xd0] sm:$0xff] }
   0xc   :  { %v71_v44 = vpack.c.bf16 %v52_v42, %v51_v41  ;;  %v54_v46 = vld [vmem:[%s1320_s0 + $0xd8] sm:$0xff]  ;;  %v55_v47 = vld [vmem:[%s1320_s0 + $0xe0] sm:$0xff]  ;;  %v56_v48 = vld [vmem:[%s1320_s0 + $0xe8] sm:$0xff] }
   0xd   :  { %v72_v49 = vpack.c.bf16 %v54_v46, %v53_v45  ;;  %v73_v50 = vpack.c.bf16 %v56_v48, %v55_v47  ;;  %v57_v51 = vld [vmem:[%s1320_s0 + $0xf0] sm:$0xff]  ;;  %v58_v52 = vld [vmem:[%s1320_s0 + $0xf8] sm:$0xff]  ;;  %v1018_v55 = vld [vmem:[%s1321_s3 + $0x8] sm:$0xff]  }
   0xe   :  { %821 = vmatmul.mubr.msk.bf16.gmra.mxu0 %vm90_vm0, %v62_v14  ;;  %853 = vmatpush3.bf16.msra.mxu1 %v1014_v22  ;;  %v74_v53 = vpack.c.bf16 %v58_v52, %v57_v51  ;;  %v1017_v54 = vld [vmem:[%s1321_s3 + $0x10] sm:$0xff]   ;;  %v1019_v56 = vld [vmem:[%s1321_s3] sm:$0xff]  }
   0xf   :  { %824 = vmatprep.mubr.msk.bf16.mxu0 %vm90_vm0, %v63_v15  ;;  %854 = vmatprep.subr.bf16.mxu1 %v1015_v25  ;;  %v1203_v59 = vld [vmem:[%s1322_s2] ss:$0 sm:$0xff] }
  0x12   :  { %855 = vmatpush3.bf16.msra.mxu1 %v1015_v25 }
  0x13   :  { %856 = vmatprep.subr.bf16.mxu1 %v1016_v30 }
  0x16   :  { %825 = vmatmul.mubr.msk.bf16.gmra.mxu0 %vm90_vm0, %v64_v23  ;;  %857 = vmatpush3.bf16.msra.mxu1 %v1016_v30 }
  0x17   :  { %828 = vmatprep.mubr.msk.bf16.mxu0 %vm90_vm0, %v65_v24  ;;  %858 = vmatprep.subr.bf16.mxu1 %v1017_v54 }
  0x1a   :  { %859 = vmatpush3.bf16.msra.mxu1 %v1017_v54 }
  0x1b   :  { %860 = vmatprep.subr.bf16.mxu1 %v1018_v55 }
  0x1e   :  { %829 = vmatmul.mubr.msk.bf16.gmra.mxu0 %vm90_vm0, %v66_v31  ;;  %861 = vmatpush3.bf16.msra.mxu1 %v1018_v55 }
  0x1f   :  { %832 = vmatprep.mubr.msk.bf16.mxu0 %vm90_vm0, %v67_v32  ;;  %862 = vmatprep.subr.bf16.mxu1 %v1019_v56 }
  0x22   :  { %863 = vmatpush3.bf16.msra.mxu1 %v1019_v56 }
  0x26   :  { %833 = vmatmul.mubr.msk.bf16.gmra.mxu0 %vm90_vm0, %v68_v37 }
  0x27   :  { %836 = vmatprep.mubr.msk.bf16.mxu0 %vm90_vm0, %v69_v38 }
  0x2e   :  { %837 = vmatmul.mubr.msk.bf16.gmra.mxu0 %vm90_vm0, %v70_v43 }
  0x2f   :  { %840 = vmatprep.mubr.msk.bf16.mxu0 %vm90_vm0, %v71_v44 }
  0x36   :  { %841 = vmatmul.mubr.msk.bf16.gmra.mxu0 %vm90_vm0, %v72_v49 }
  0x37   :  { %844 = vmatprep.mubr.msk.bf16.mxu0 %vm90_vm0, %v73_v50 }
  0x3e   :  { %845 = vmatmul.mubr.msk.bf16.gmra.mxu0 %vm90_vm0, %v74_v53 }
  0xc6   :  { %v818_v57 = vpop.f32.mrf.mxu0 }
  0xc7   :  { %v182_v63 = vadd.f32 %v818_v57, %v1203_v59 }
  0xc8   :  { %v173_v58 = vpop.f32.mrf.mxu0 }
  0xc9   :  { %v174_v61 = vadd.f32 %v1203_v59, %v173_v58  ;;  %v302_v6 = vmax.f32 %v182_v63, 0.0 }
  0xca   :  { %v819_v60 = vpop.f32.mrf.mxu0 }
  0xcb   :  { %v185_v62 = vadd.f32 %v819_v60, %v1203_v59  ;;  %v300_v4 = vmax.f32 %v174_v61, 0.0 }
  0xcc   :  { %v176_v0 = vpop.f32.mrf.mxu0 }
  0xcd   :  { %v177_v1 = vadd.f32 %v1203_v59, %v176_v0  ;;  %v303_v2 = vmax.f32 %v185_v62, 0.0 }
  0xce   :  { %v822_v3 = vpop.f32.mrf.mxu0 }
  0xcf   :  { %v301_v5 = vmax.f32 %v177_v1, 0.0  ;;  %v333_v9 = vpack.c.bf16 %v303_v2, %v302_v6  ;;  %v198_v13 = vadd.f32 %v822_v3, %v1203_v59 }
  0xd0   :  { %v189_v7 = vpop.f32.mrf.mxu0 }
  0xd1   :  { %v332_v8 = vpack.c.bf16 %v301_v5, %v300_v4  ;;  %v190_v11 = vadd.f32 %v1203_v59, %v189_v7  ;;  %v306_v20 = vmax.f32 %v198_v13, 0.0 }
  0xd2   :  { %v823_v10 = vpop.f32.mrf.mxu0 }
  0xd3   :  { %v201_v12 = vadd.f32 %v823_v10, %v1203_v59  ;;  %864 = vmatprep.mubr.bf16.mxu1 %v332_v8  ;;  %v304_v18 = vmax.f32 %v190_v11, 0.0 }
  0xd4   :  { %v192_v14 = vpop.f32.mrf.mxu0  ;;  %865 = vmatmul.mubr.bf16.vlgmr.msra.gmra.mxu1 %v333_v9 }
  0xd5   :  { %v193_v15 = vadd.f32 %v1203_v59, %v192_v14  ;;  %v307_v16 = vmax.f32 %v201_v12, 0.0 }
  0xd6   :  { %v826_v17 = vpop.f32.mrf.mxu0 }
  0xd7   :  { %v305_v19 = vmax.f32 %v193_v15, 0.0  ;;  %v335_v23 = vpack.c.bf16 %v307_v16, %v306_v20  ;;  %v214_v27 = vadd.f32 %v826_v17, %v1203_v59 }
  0xd8   :  { %v205_v21 = vpop.f32.mrf.mxu0 }
  0xd9   :  { %v334_v22 = vpack.c.bf16 %v305_v19, %v304_v18  ;;  %v206_v25 = vadd.f32 %v1203_v59, %v205_v21  ;;  %v310_v34 = vmax.f32 %v214_v27, 0.0 }
  0xda   :  { %v827_v24 = vpop.f32.mrf.mxu0 }
  0xdb   :  { %v217_v26 = vadd.f32 %v827_v24, %v1203_v59  ;;  %868 = vmatprep.mubr.bf16.mxu1 %v334_v22  ;;  %v308_v32 = vmax.f32 %v206_v25, 0.0 }
  0xdc   :  { %v208_v28 = vpop.f32.mrf.mxu0  ;;  %869 = vmatmul.mubr.bf16.gmra.mxu1 %v335_v23 }
  0xdd   :  { %v209_v29 = vadd.f32 %v1203_v59, %v208_v28  ;;  %v311_v30 = vmax.f32 %v217_v26, 0.0 }
  0xde   :  { %v830_v31 = vpop.f32.mrf.mxu0 }
  0xdf   :  { %v309_v33 = vmax.f32 %v209_v29, 0.0  ;;  %v337_v37 = vpack.c.bf16 %v311_v30, %v310_v34  ;;  %v230_v41 = vadd.f32 %v830_v31, %v1203_v59 }
  0xe0   :  { %v221_v35 = vpop.f32.mrf.mxu0 }
  0xe1   :  { %v336_v36 = vpack.c.bf16 %v309_v33, %v308_v32  ;;  %v222_v39 = vadd.f32 %v1203_v59, %v221_v35  ;;  %v314_v48 = vmax.f32 %v230_v41, 0.0 }
  0xe2   :  { %v831_v38 = vpop.f32.mrf.mxu0 }
  0xe3   :  { %v233_v40 = vadd.f32 %v831_v38, %v1203_v59  ;;  %872 = vmatprep.mubr.bf16.mxu1 %v336_v36  ;;  %v312_v46 = vmax.f32 %v222_v39, 0.0 }
  0xe4   :  { %v224_v42 = vpop.f32.mrf.mxu0  ;;  %873 = vmatmul.mubr.bf16.gmra.mxu1 %v337_v37 }
  0xe5   :  { %v225_v43 = vadd.f32 %v1203_v59, %v224_v42  ;;  %v315_v44 = vmax.f32 %v233_v40, 0.0 }
  0xe6   :  { %v834_v45 = vpop.f32.mrf.mxu0 }
  0xe7   :  { %v313_v47 = vmax.f32 %v225_v43, 0.0  ;;  %v339_v51 = vpack.c.bf16 %v315_v44, %v314_v48  ;;  %v246_v55 = vadd.f32 %v834_v45, %v1203_v59 }
  0xe8   :  { %v237_v49 = vpop.f32.mrf.mxu0 }
  0xe9   :  { %v338_v50 = vpack.c.bf16 %v313_v47, %v312_v46  ;;  %v238_v53 = vadd.f32 %v1203_v59, %v237_v49  ;;  %v318_v63 = vmax.f32 %v246_v55, 0.0 }
  0xea   :  { %v835_v52 = vpop.f32.mrf.mxu0 }
  0xeb   :  { %v249_v54 = vadd.f32 %v835_v52, %v1203_v59  ;;  %876 = vmatprep.mubr.bf16.mxu1 %v338_v50  ;;  %v316_v61 = vmax.f32 %v238_v53, 0.0 }
  0xec   :  { %v240_v56 = vpop.f32.mrf.mxu0  ;;  %877 = vmatmul.mubr.bf16.gmra.mxu1 %v339_v51 }
  0xed   :  { %v241_v57 = vadd.f32 %v1203_v59, %v240_v56  ;;  %v319_v58 = vmax.f32 %v249_v54, 0.0 }
  0xee   :  { %v838_v60 = vpop.f32.mrf.mxu0 }
  0xef   :  { %v317_v62 = vmax.f32 %v241_v57, 0.0  ;;  %v262_v0 = vadd.f32 %v838_v60, %v1203_v59  ;;  %v341_v4 = vpack.c.bf16 %v319_v58, %v318_v63  ;;  %v1258_v58 = vld [vmem:[%s1323_s4] ss:$0 sm:$0xff] }
  0xf0   :  { %v253_v1 = vpop.f32.mrf.mxu0 }
  0xf1   :  { %v340_v2 = vpack.c.bf16 %v317_v62, %v316_v61  ;;  %v254_v3 = vadd.f32 %v1203_v59, %v253_v1  ;;  %v322_v7 = vmax.f32 %v262_v0, 0.0 }
  0xf2   :  { %v839_v5 = vpop.f32.mrf.mxu0 }
  0xf3   :  { %v265_v6 = vadd.f32 %v839_v5, %v1203_v59  ;;  %880 = vmatprep.mubr.bf16.mxu1 %v340_v2  ;;  %v320_v9 = vmax.f32 %v254_v3, 0.0 }
  0xf4   :  { %v256_v8 = vpop.f32.mrf.mxu0  ;;  %881 = vmatmul.mubr.bf16.gmra.mxu1 %v341_v4 }
  0xf5   :  { %v323_v10 = vmax.f32 %v265_v6, 0.0  ;;  %v257_v11 = vadd.f32 %v1203_v59, %v256_v8 }
  0xf6   :  { %v842_v12 = vpop.f32.mrf.mxu0 }
  0xf7   :  { %v321_v13 = vmax.f32 %v257_v11, 0.0  ;;  %v343_v14 = vpack.c.bf16 %v323_v10, %v322_v7  ;;  %v278_v15 = vadd.f32 %v842_v12, %v1203_v59 }
  0xf8   :  { %v269_v16 = vpop.f32.mrf.mxu0 }
  0xf9   :  { %v342_v17 = vpack.c.bf16 %v321_v13, %v320_v9  ;;  %v270_v18 = vadd.f32 %v1203_v59, %v269_v16  ;;  %v326_v21 = vmax.f32 %v278_v15, 0.0 }
  0xfa   :  { %v843_v19 = vpop.f32.mrf.mxu0 }
  0xfb   :  { %v281_v20 = vadd.f32 %v843_v19, %v1203_v59  ;;  %884 = vmatprep.mubr.bf16.mxu1 %v342_v17  ;;  %v324_v23 = vmax.f32 %v270_v18, 0.0 }
  0xfc   :  { %v272_v22 = vpop.f32.mrf.mxu0  ;;  %885 = vmatmul.mubr.bf16.gmra.mxu1 %v343_v14 }
  0xfd   :  { %v327_v24 = vmax.f32 %v281_v20, 0.0  ;;  %v273_v25 = vadd.f32 %v1203_v59, %v272_v22 }
  0xfe   :  { %v846_v26 = vpop.f32.mrf.mxu0 }
  0xff   :  { %v325_v27 = vmax.f32 %v273_v25, 0.0  ;;  %v345_v28 = vpack.c.bf16 %v327_v24, %v326_v21  ;;  %v294_v29 = vadd.f32 %v846_v26, %v1203_v59 }
 0x100   :  { %v285_v30 = vpop.f32.mrf.mxu0 }
 0x101   :  { %v344_v31 = vpack.c.bf16 %v325_v27, %v324_v23  ;;  %v286_v32 = vadd.f32 %v1203_v59, %v285_v30  ;;  %v330_v35 = vmax.f32 %v294_v29, 0.0 }
 0x102   :  { %v847_v33 = vpop.f32.mrf.mxu0 }
 0x103   :  { %v297_v34 = vadd.f32 %v847_v33, %v1203_v59  ;;  %888 = vmatprep.mubr.bf16.mxu1 %v344_v31  ;;  %v328_v37 = vmax.f32 %v286_v32, 0.0 }
 0x104   :  { %v288_v36 = vpop.f32.mrf.mxu0  ;;  %889 = vmatmul.mubr.bf16.gmra.mxu1 %v345_v28 }
 0x105   :  { %v331_v38 = vmax.f32 %v297_v34, 0.0  ;;  %v289_v39 = vadd.f32 %v1203_v59, %v288_v36 }
 0x107   :  { %v329_v40 = vmax.f32 %v289_v39, 0.0  ;;  %v347_v41 = vpack.c.bf16 %v331_v38, %v330_v35 }
 0x109   :  { %v346_v42 = vpack.c.bf16 %v329_v40, %v328_v37 }
 0x10b   :  { %892 = vmatprep.mubr.bf16.mxu1 %v346_v42 }
 0x10c   :  { %893 = vmatmul.mubr.bf16.gmra.mxu1 %v347_v41 }
 0x194   :  { %v866_v43 = vpop.f32.mrf.mxu1 }
 0x195   :  { %v462_v9 = vadd.f32 %v866_v43, %v1258_v58 }
 0x196   :  { %v453_v44 = vpop.f32.mrf.mxu1 }
 0x197   :  { %v454_v61 = vadd.f32 %v1258_v58, %v453_v44  ;;  %v582_v17 = vmax.f32 %v462_v9, 0.0 }
 0x198   :  { %v867_v45 = vpop.f32.mrf.mxu1 }
 0x199   :  { %v580_v1 = vmax.f32 %v454_v61, 0.0  ;;  %v465_v18 = vadd.f32 %v867_v45, %v1258_v58 }
 0x19a   :  { %v456_v46 = vpop.f32.mrf.mxu1 }
 0x19b   :  { %v457_v2 = vadd.f32 %v1258_v58, %v456_v46  ;;  %v583_v23 = vmax.f32 %v465_v18, 0.0 }
 0x19c   :  { %v870_v47 = vpop.f32.mrf.mxu1 }
 0x19d   :  { %v581_v10 = vmax.f32 %v457_v2, 0.0  ;;  %v478_v35 = vadd.f32 %v870_v47, %v1258_v58 }
 0x19e   :  { %v469_v48 = vpop.f32.mrf.mxu1 }
 0x19f   :  { %v470_v24 = vadd.f32 %v1258_v58, %v469_v48  ;;  %v586_v41 = vmax.f32 %v478_v35, 0.0 }
 0x1a0   :  { %v1237_v49 = vpop.f32.mrf.mxu1 }
 0x1a1   :  { %v584_v29 = vmax.f32 %v470_v24, 0.0  ;;  %v481_v42 = vadd.f32 %v1237_v49, %v1258_v58 }
 0x1a2   :  { %v472_v50 = vpop.f32.mrf.mxu1 }
 0x1a3   :  { %v473_v30 = vadd.f32 %v1258_v58, %v472_v50  ;;  %v587_v48 = vmax.f32 %v481_v42, 0.0 }
 0x1a4   :  { %v1239_v51 = vpop.f32.mrf.mxu1 }
 0x1a5   :  { %v585_v36 = vmax.f32 %v473_v30, 0.0 }
 0x1a6   :  { %v1241_v52 = vpop.f32.mrf.mxu1 }
 0x1a7   :  { %v486_v47 = vadd.f32 %v1258_v58, %v1241_v52 }
 0x1a8   :  { %v1243_v53 = vpop.f32.mrf.mxu1 }
 0x1aa   :  { %v1245_v59 = vpop.f32.mrf.mxu1 }
 0x1ab   :  { %v489_v49 = vadd.f32 %v1258_v58, %v1245_v59  ;;  %v497_v59 = vadd.f32 %v1243_v53, %v1258_v58 }
 0x1ac   :  { %v1247_v54 = vpop.f32.mrf.mxu1 }
 0x1ad   :  { %v589_v52 = vmax.f32 %v489_v49, 0.0 }
 0x1ae   :  { %v1249_v55 = vpop.f32.mrf.mxu1 }
 0x1b0   :  { %v1251_v56 = vpop.f32.mrf.mxu1 }
 0x1b2   :  { %v1253_v57 = vpop.f32.mrf.mxu1 }
 0x1b4   :  { %v882_v60 = vpop.f32.mrf.mxu1 }
 0x1b5   :  { %v526_v5 = vadd.f32 %v882_v60, %v1258_v58 }
 0x1b6   :  { %v517_v62 = vpop.f32.mrf.mxu1 }
 0x1b7   :  { %v518_v63 = vadd.f32 %v1258_v58, %v517_v62  ;;  %v598_v13 = vmax.f32 %v526_v5, 0.0 }
 0x1b8   :  { %v883_v0 = vpop.f32.mrf.mxu1 }
 0x1b9   :  { %v596_v3 = vmax.f32 %v518_v63, 0.0  ;;  %v529_v14 = vadd.f32 %v883_v0, %v1258_v58  ;;  %v901_v21 = vpack.i.bf16 %v582_v17, %v598_v13  ;;  %v588_v63 = vmax.f32 %v486_v47, 0.0 }
 0x1ba   :  { %v520_v4 = vpop.f32.mrf.mxu1 }
 0x1bb   :  { %v521_v6 = vadd.f32 %v1258_v58, %v520_v4  ;;  %v897_v7 = vpack.i.bf16 %v580_v1, %v596_v3  ;;  %v599_v19 = vmax.f32 %v529_v14, 0.0  ;;  %v494_v4 = vadd.f32 %v1239_v51, %v1258_v58 }
 0x1bc   :  { %v886_v8 = vpop.f32.mrf.mxu1  ;;  %v591_v14 = vmax.f32 %v497_v59, 0.0  ;;  %v502_v51 = vadd.f32 %v1258_v58, %v1249_v55 }
 0x1bd   :  { %v597_v11 = vmax.f32 %v521_v6, 0.0  ;;  %898 = vxpose.xlu0.b32.start [1/16] %v897_v7, 128  ;;  %v903_v27 = vpack.i.bf16 %v583_v23, %v599_v19  ;;  %v542_v31 = vadd.f32 %v886_v8, %v1258_v58  ;;  %v590_v9 = vmax.f32 %v494_v4, 0.0 }
 0x1be   :  { %v533_v12 = vpop.f32.mrf.mxu1  ;;  %v592_v18 = vmax.f32 %v502_v51, 0.0  ;;  %v505_v19 = vadd.f32 %v1258_v58, %v1253_v57 }
 0x1bf   :  { %v899_v15 = vpack.i.bf16 %v581_v10, %v597_v11  ;;  %v534_v20 = vadd.f32 %v1258_v58, %v533_v12  ;;  %v602_v37 = vmax.f32 %v542_v31, 0.0  ;;  %v1020_v31 = vmov 0  }
 0x1c0   :  { %v887_v16 = vpop.f32.mrf.mxu1  ;;  %v593_v23 = vmax.f32 %v505_v19, 0.0  ;;  %731 = vmatprep.mubr.bf16.mxu0 %v1020_v31  ;;  %1009 = vset.pattern.permute.xlu1 %v1020_v31 }
 0x1c1   :  { %900 = vxpose.xlu0.b32.cont [2/16] %v899_v15, 128  ;;  %v600_v25 = vmax.f32 %v534_v20, 0.0  ;;  %v545_v38 = vadd.f32 %v887_v16, %v1258_v58  ;;  %v909_v45 = vpack.i.bf16 %v586_v41, %v602_v37 }
 0x1c2   :  { %v536_v22 = vpop.f32.mrf.mxu1 }
 0x1c3   :  { %v537_v26 = vadd.f32 %v1258_v58, %v536_v22  ;;  %v905_v33 = vpack.i.bf16 %v584_v29, %v600_v25  ;;  %v603_v43 = vmax.f32 %v545_v38, 0.0  ;;  %v510_v22 = vadd.f32 %v1247_v54, %v1258_v58  ;;  %v693_v54 = vld [vmem:[%s1324_s6] sm:$0xff] }
 0x1c4   :  { %v890_v28 = vpop.f32.mrf.mxu1  ;;  %696 = vperm.xlu1 %1009, %v693_v54  }
 0x1c5   :  { %902 = vxpose.xlu0.b32.cont [3/16] %v901_v21, 128  ;;  %v601_v32 = vmax.f32 %v537_v26, 0.0  ;;  %v911_v61 = vpack.i.bf16 %v587_v48, %v603_v43  ;;  %v558_v0 = vadd.f32 %v890_v28, %v1258_v58  ;;  %v594_v26 = vmax.f32 %v510_v22, 0.0 }
 0x1c6   :  { %v549_v34 = vpop.f32.mrf.mxu1 }
 0x1c7   :  { %v907_v39 = vpack.i.bf16 %v585_v36, %v601_v32  ;;  %v550_v44 = vadd.f32 %v1258_v58, %v549_v34  ;;  %v606_v5 = vmax.f32 %v558_v0, 0.0 }
 0x1c8   :  { %v891_v40 = vpop.f32.mrf.mxu1 }
 0x1c9   :  { %904 = vxpose.xlu0.b32.cont [4/16] %v903_v27, 128  ;;  %v604_v50 = vmax.f32 %v550_v44, 0.0  ;;  %v561_v6 = vadd.f32 %v891_v40, %v1258_v58  ;;  %v917_v12 = vpack.i.bf16 %v590_v9, %v606_v5  ;;  %v513_v27 = vadd.f32 %v1251_v56, %v1258_v58 }
 0x1ca   :  { %v552_v46 = vpop.f32.mrf.mxu1 }
 0x1cb   :  { %v553_v60 = vadd.f32 %v1258_v58, %v552_v46  ;;  %v913_v2 = vpack.i.bf16 %v588_v63, %v604_v50  ;;  %v607_v10 = vmax.f32 %v561_v6, 0.0  ;;  %v595_v29 = vmax.f32 %v513_v27, 0.0 }
 0x1cc   :  { %v894_v62 = vpop.f32.mrf.mxu1 }
 0x1cd   :  { %906 = vxpose.xlu0.b32.cont [5/16] %v905_v33, 128  ;;  %v605_v1 = vmax.f32 %v553_v60, 0.0  ;;  %v919_v17 = vpack.i.bf16 %v591_v14, %v607_v10  ;;  %v574_v53 = vadd.f32 %v894_v62, %v1258_v58 }
 0x1ce   :  { %v565_v3 = vpop.f32.mrf.mxu1 }
 0x1cf   :  { %v915_v7 = vpack.i.bf16 %v589_v52, %v605_v1  ;;  %v566_v11 = vadd.f32 %v1258_v58, %v565_v3  ;;  %v610_v55 = vmax.f32 %v574_v53, 0.0 }
 0x1d0   :  { %v895_v8 = vpop.f32.mrf.mxu1 }
 0x1d1   :  { %908 = vxpose.xlu0.b32.cont [6/16] %v907_v39, 128  ;;  %v608_v15 = vmax.f32 %v566_v11, 0.0  ;;  %v577_v24 = vadd.f32 %v895_v8, %v1258_v58  ;;  %v925_v28 = vpack.i.bf16 %v594_v26, %v610_v55 }
 0x1d2   :  { %v568_v13 = vpop.f32.mrf.mxu1 }
 0x1d3   :  { %v569_v16 = vadd.f32 %v1258_v58, %v568_v13  ;;  %v921_v21 = vpack.i.bf16 %v592_v18, %v608_v15  ;;  %v611_v57 = vmax.f32 %v577_v24, 0.0 }
 0x1d5   :  { %910 = vxpose.xlu0.b32.cont [7/16] %v909_v45, 128  ;;  %v609_v20 = vmax.f32 %v569_v16, 0.0  ;;  %v927_v30 = vpack.i.bf16 %v595_v29, %v611_v57 }
 0x1d7   :  { %v923_v25 = vpack.i.bf16 %v593_v23, %v609_v20 }
 0x1d9   :  { %912 = vxpose.xlu0.b32.cont [8/16] %v911_v61, 128 }
 0x1dd   :  { %914 = vxpose.xlu0.b32.cont [9/16] %v913_v2, 128 }
 0x1e1   :  { %916 = vxpose.xlu0.b32.cont [10/16] %v915_v7, 128 }
 0x1e5   :  { %918 = vxpose.xlu0.b32.cont [11/16] %v917_v12, 128 }
 0x1e9   :  { %920 = vxpose.xlu0.b32.cont [12/16] %v919_v17, 128 }
 0x1ed   :  { %922 = vxpose.xlu0.b32.cont [13/16] %v921_v21, 128 }
 0x1f1   :  { %924 = vxpose.xlu0.b32.cont [14/16] %v923_v25, 128 }
 0x1f5   :  { %926 = vxpose.xlu0.b32.cont [15/16] %v925_v28, 128 }
 0x1f9   :  { %928 = vxpose.xlu0.b32.end [16/16] %v927_v30, 128 }
 0x222   :  { %1010 = vset.pattern.permute.xlu0 %v1020_v31 }
 0x239   :  { %v929_v32 = vpop.trf.xlu0 }
 0x23a   :  { %v933_v33 = vunpack.i.h.bf16 %v929_v32  ;;  %v930_v34 = vunpack.i.l.bf16 %v929_v32  ;;  %v692_v32 = vld [vmem:[%s1325_s5] sm:$0xf] }
 0x23d   :  { %v934_v56 = vpop.trf.xlu0 }
 0x23e   :  { %v938_v58 = vunpack.i.h.bf16 %v934_v56  ;;  %v935_v35 = vunpack.i.l.bf16 %v934_v56 }
 0x240   :  { %v1304_v36 = vpack.c.bf16 %v935_v35, %v930_v34  ;;  %v1306_v37 = vpack.c.bf16 %v938_v58, %v933_v33  ;;  %v697_v33 = vpop.permute.xlu1 %696 }
 0x241   :  { %v939_v38 = vpop.trf.xlu0 }
 0x242   :  { %v943_v39 = vunpack.i.h.bf16 %v939_v38  ;;  %v940_v40 = vunpack.i.l.bf16 %v939_v38 }
 0x245   :  { %v944_v41 = vpop.trf.xlu0 }
 0x246   :  { %v948_v42 = vunpack.i.h.bf16 %v944_v41  ;;  %v945_v43 = vunpack.i.l.bf16 %v944_v41 }
 0x248   :  { %v679_v44 = vpack.c.bf16 %v945_v43, %v940_v40  ;;  %v678_v45 = vpack.c.bf16 %v948_v42, %v943_v39 }
 0x249   :  { %v949_v46 = vpop.trf.xlu0 }
 0x24a   :  { %v950_v57 = vunpack.i.l.bf16 %v949_v46  ;;  %v953_v31 = vunpack.i.h.bf16 %v949_v46 }
 0x24d   :  { %v954_v48 = vpop.trf.xlu0 }
 0x24e   :  { %v955_v25 = vunpack.i.l.bf16 %v954_v48  ;;  %v958_v28 = vunpack.i.h.bf16 %v954_v48 }
 0x250   :  { %v681_v30 = vpack.c.bf16 %v955_v25, %v950_v57  ;;  %v680_v54 = vpack.c.bf16 %v958_v28, %v953_v31 }
 0x251   :  { %v959_v47 = vpop.trf.xlu0 }
 0x252   :  { %v960_v23 = vunpack.i.l.bf16 %v959_v47  ;;  %v963_v27 = vunpack.i.h.bf16 %v959_v47 }
 0x255   :  { %v964_v50 = vpop.trf.xlu0 }
 0x256   :  { %v965_v20 = vunpack.i.l.bf16 %v964_v50  ;;  %v968_v55 = vunpack.i.h.bf16 %v964_v50 }
 0x258   :  { %v683_v26 = vpack.c.bf16 %v965_v20, %v960_v23  ;;  %v682_v29 = vpack.c.bf16 %v968_v55, %v963_v27 }
 0x259   :  { %v969_v60 = vpop.trf.xlu0 }
 0x25a   :  { %v970_v18 = vunpack.i.l.bf16 %v969_v60  ;;  %v973_v22 = vunpack.i.h.bf16 %v969_v60 }
 0x25d   :  { %v974_v61 = vpop.trf.xlu0 }
 0x25e   :  { %v975_v15 = vunpack.i.l.bf16 %v974_v61  ;;  %v978_v19 = vunpack.i.h.bf16 %v974_v61 }
 0x260   :  { %v685_v21 = vpack.c.bf16 %v975_v15, %v970_v18  ;;  %v684_v24 = vpack.c.bf16 %v978_v19, %v973_v22 }
 0x261   :  { %v979_v62 = vpop.trf.xlu0 }
 0x262   :  { %v980_v13 = vunpack.i.l.bf16 %v979_v62  ;;  %v983_v17 = vunpack.i.h.bf16 %v979_v62 }
 0x265   :  { %v984_v63 = vpop.trf.xlu0 }
 0x266   :  { %v985_v10 = vunpack.i.l.bf16 %v984_v63  ;;  %v988_v14 = vunpack.i.h.bf16 %v984_v63 }
 0x268   :  { %v687_v16 = vpack.c.bf16 %v985_v10, %v980_v13  ;;  %v686_v53 = vpack.c.bf16 %v988_v14, %v983_v17 }
 0x269   :  { %v989_v49 = vpop.trf.xlu0 }
 0x26a   :  { %v990_v7 = vunpack.i.l.bf16 %v989_v49  ;;  %v993_v12 = vunpack.i.h.bf16 %v989_v49 }
 0x26d   :  { %v994_v0 = vpop.trf.xlu0 }
 0x26e   :  { %v995_v2 = vunpack.i.l.bf16 %v994_v0  ;;  %v998_v59 = vunpack.i.h.bf16 %v994_v0 }
 0x270   :  { %v689_v11 = vpack.c.bf16 %v995_v2, %v990_v7  ;;  %v688_v51 = vpack.c.bf16 %v998_v59, %v993_v12 }
 0x271   :  { %v999_v1 = vpop.trf.xlu0 }
 0x272   :  { %v1003_v3 = vunpack.i.h.bf16 %v999_v1  ;;  %v1000_v4 = vunpack.i.l.bf16 %v999_v1 }
 0x275   :  { %v1004_v52 = vpop.trf.xlu0 }
 0x276   :  { %v1008_v5 = vunpack.i.h.bf16 %v1004_v52  ;;  %v1005_v6 = vunpack.i.l.bf16 %v1004_v52 }
 0x278   :  { %v690_v8 = vpack.c.bf16 %v1008_v5, %v1003_v3  ;;  %v691_v9 = vpack.c.bf16 %v1005_v6, %v1000_v4 }
 0x27a   :  { %699 = vmatprep.subr.bf16.mxu0 %v691_v9 }
 0x27b   :  { %700 = vmatpush1.bf16.msra.mxu0 %v690_v8 }
 0x27c   :  { %701 = vmatprep.subr.bf16.mxu0 %v689_v11 }
 0x27f   :  { %702 = vmatpush1.bf16.msra.mxu0 %v688_v51 }
 0x280   :  { %703 = vmatprep.subr.bf16.mxu0 %v687_v16 }
 0x283   :  { %704 = vmatpush1.bf16.msra.mxu0 %v686_v53 }
 0x284   :  { %705 = vmatprep.subr.bf16.mxu0 %v685_v21 }
 0x287   :  { %706 = vmatpush1.bf16.msra.mxu0 %v684_v24 }
 0x288   :  { %707 = vmatprep.subr.bf16.mxu0 %v683_v26 }
 0x28b   :  { %708 = vmatpush1.bf16.msra.mxu0 %v682_v29 }
 0x28c   :  { %709 = vmatprep.subr.bf16.mxu0 %v681_v30 }
 0x28f   :  { %710 = vmatpush1.bf16.msra.mxu0 %v680_v54 }
 0x290   :  { %711 = vmatprep.subr.bf16.mxu0 %v679_v44 }
 0x293   :  { %712 = vmatpush1.bf16.msra.mxu0 %v678_v45 }
 0x294   :  { %713 = vmatprep.subr.bf16.mxu0 %v1304_v36 }
 0x297   :  { %714 = vmatpush1.bf16.msra.mxu0 %v1306_v37 }
 0x29a   :  { %732 = vmatmul.mubr.bf16.vlgmr.msra.gmra.mxu0 %v692_v32 }
 0x35a   :  { %v733_v34 = vpop.f32.mrf.mxu0 }
 0x35b   :  { %v734_v56 = vadd.f32 %v733_v34, %v697_v33 }
 0x35c   :  { %v735_v58 = vpop.f32.mrf.mxu0 }
 0x35d   :  { %v736_v35 = vadd.f32 %v735_v58, %v697_v33  ;;  %740 = vst [vmem:[%s1326_s7] sm:$0xff] %v734_v56 }
 0x35e   :  { %v737_v38 = vpop.f32.mrf.mxu0 }
 0x35f   :  { %741 = vst [vmem:[%s1326_s7 + $0x8] sm:$0xff] %v736_v35 }
 0x360   :  { %v738_v36 = vpop.f32.mrf.mxu0 }

</bundles_post_ra>
